<compile_context>
chip_gen: v7x
topology: tpu7x:2x2x1
jax: 0.10.0
libtpu: 0.0.40
codegen_flags: <defaults>
</compile_context>

<pallas_src>
import jax
import jax.numpy as jnp
from jax.experimental import pallas as pl
from jax.experimental.pallas import tpu as pltpu


def _cdiv(a, b):
    return -(-a // b)


def _round_up(a, b):
    return _cdiv(a, b) * b


def _matmul_dtype(cin, compute_dtype):
    # bf16 (cin, M) inputs tile at (16, 128) sublanes, so for cin < 16 the
    # sublane padding cancels the byte saving; keep f32 there.
    return compute_dtype if cin >= 16 else jnp.float32


def _default_num_cores():
    """Best-effort TensorCore count per chip: 2 on v7x, 1 on v5e/v6e."""
    try:
        kind = jax.devices()[0].device_kind.lower()
    except Exception:
        return 1
    return 2 if ("v7" in kind or "tpu7" in kind) else 1


def _make_detect_kernel(stride, nx, ny, tm, with_raw):
    """Fused 1x1-conv (matmul) + bias + sigmoid + polynomial box-decode."""
    pix_per_img = float(ny * nx)
    nx_f = float(nx)

    def kernel(xt_ref, wt_ref, b_ref, const_ref, *out_refs):
        if with_raw:
            raw_ref, y_ref = out_refs
        else:
            (y_ref,) = out_refs

        # (co, cin) @ (cin, TM) on the MXU; f32 accumulation.
        raw = jnp.dot(wt_ref[...], xt_ref[...],
                      preferred_element_type=jnp.float32) + b_ref[...]
        if with_raw:
            raw_ref[...] = raw.astype(raw_ref.dtype)

        y = jax.nn.sigmoid(raw)

        # In-kernel per-column grid coordinates (no gxy DMA).  Global column
        # m of the (co, M) output is pixel (b, yy, xx) with
        #   m = b*ny*nx + yy*nx + xx.
        # Quotients are tiny (< bs*ny) so f32 floor-division is exact; the
        # +0.5 keeps a >= 0.5/denominator margin against rounding either way.
        m = (pl.program_id(0) * tm
             + jax.lax.broadcasted_iota(jnp.int32, (1, tm), 1)
             ).astype(jnp.float32)                                  # (1, TM)
        pix = m - pix_per_img * jnp.floor((m + 0.5) / pix_per_img)  # yy*nx+xx
        gy = jnp.floor((pix + 0.5) / nx_f)
        gx = pix - nx_f * gy

        # Per-row decode coefficients (precomputed host-side):
        #   xy rows : (2*y - 0.5 + g) * stride = (0*y + 2s)*y + s*g - 0.5*s
        #   wh rows : (2*y)^2 * anchor        = (4*anc*y + 0)*y
        #   rest    : y                       = (0*y + 1)*y
        c1 = const_ref[:, 0:1]    # 4*anchor on wh rows, 0 elsewhere
        c2 = const_ref[:, 1:2]    # 2*stride on xy rows, 0 on wh, 1 elsewhere
        c3x = const_ref[:, 2:3]   # stride on the box-x row
        c3y = const_ref[:, 3:4]   # stride on the box-y row
        c4 = const_ref[:, 4:5]    # -0.5*stride on xy rows

        g = c3x * gx + c3y * gy + c4                     # (co, TM)
        y_ref[...] = ((c1 * y + c2) * y + g).astype(y_ref.dtype)

    return kernel


def _choose_row_tiling(m, tm_max=2048, num_cores=1):
    """Lane-aligned row tile, padded column count and grid step count.

    Tiles are multiples of 128 (lane width) and as large as tm_max allows
    (per-step overhead ~0.35 us; short DMAs cap HBM efficiency).  On 1-TC
    chips (v5e/v6e) we never split just to get more steps.  On multi-TC
    chips (v7x) the step count is rounded up to a multiple of num_cores so
    the 'parallel' grid axis gives each core a balanced share.
    """
    lanes = 128
    m128 = _round_up(m, lanes)
    tm = min(tm_max, m128)
    steps = _cdiv(m128, tm)
    if num_cores > 1 and m128 >= num_cores * lanes:
        steps = _round_up(steps, num_cores)
        tm = _round_up(_cdiv(m128, steps), lanes)
        steps = _round_up(_cdiv(m128, tm), num_cores)
    m_pad = steps * tm
    return tm, m_pad, steps


def detect_layer(x_nchw, w, b, anchors_l, stride, *, no, na,
                 compute_dtype=jnp.bfloat16, return_raw=True,
                 raw_dtype=jnp.float32, tm_max=2048, num_cores=1):
    """One detection layer: 1x1 conv + sigmoid + box decode.

    x_nchw : (bs, cin, ny, nx)   same layout as the PyTorch module input.
    w      : (co, cin)           squeezed 1x1 conv weight, co = na * no.
    b      : (co,)               conv bias.
    Returns (raw5, z): raw5 (bs, na, ny, nx, no) matching PyTorch's x[i]
    (None if return_raw=False), z (bs, na*ny*nx, no) decoded predictions.
    """
    bs, cin, ny, nx = x_nchw.shape
    co = na * no
    M = bs * ny * nx
    TM, M_pad, steps = _choose_row_tiling(M, tm_max, num_cores)
    grid = (steps,)

    op_dtype = _matmul_dtype(cin, compute_dtype)
    in_bytes = jnp.dtype(op_dtype).itemsize
    raw_bytes = jnp.dtype(raw_dtype).itemsize if return_raw else 0

    # Transposed activations (cin, M): columns ordered (b, yy, xx); M on lanes.
    x_t = jnp.transpose(x_nchw.astype(op_dtype), (1, 0, 2, 3)).reshape(cin, M)
    if M_pad != M:
        x_t = jnp.pad(x_t, ((0, 0), (0, M_pad - M)))
    w_t = w.astype(op_dtype)                              # (co, cin)
    b_col = b.astype(jnp.float32).reshape(co, 1)

    # Per-row decode coefficients for  out = (C1*y + C2)*y + C3x*gx + C3y*gy + C4
    col = jnp.arange(co)
    o_idx = col % no
    a_idx = col // no
    is_x = o_idx == 0
    is_y = o_idx == 1
    is_xy = is_x | is_y
    is_wh = (o_idx == 2) | (o_idx == 3)
    anc = jnp.where(o_idx == 2, anchors_l[a_idx, 0],
                    jnp.where(o_idx == 3, anchors_l[a_idx, 1], 0.0))
    s = float(stride)
    c1 = 4.0 * anc
    c2 = jnp.where(is_xy, 2.0 * s, jnp.where(is_wh, 0.0, 1.0))
    c3x = jnp.where(is_x, s, 0.0)
    c3y = jnp.where(is_y, s, 0.0)
    c4 = jnp.where(is_xy, -0.5 * s, 0.0)
    const = jnp.stack([c1, c2, c3x, c3y, c4], axis=1).astype(jnp.float32)  # (co,5)

    # Memory-bound regime: size VMEM / cost estimate from bytes, not flops.
    tile_bytes = TM * (cin * in_bytes + co * (4 + raw_bytes))
    resident_bytes = co * cin * in_bytes + co * 4 + co * 5 * 4
    # Cap well below v7x's 64 MiB physical VMEM; a few MiB is plenty here.
    vmem_limit = int(min(48 << 20,
                         max(4 << 20, 4 * (2 * tile_bytes + resident_bytes))))
    cost = pl.CostEstimate(
        flops=2 * M_pad * cin * co + 8 * M_pad * co,
        transcendentals=M_pad * co,
        bytes_accessed=M_pad * (cin * in_bytes + co * (4 + raw_bytes))
                       + resident_bytes)

    out_shape = []
    out_specs = []
    if return_raw:
        out_shape.append(jax.ShapeDtypeStruct((co, M_pad), raw_dtype))
        out_specs.append(pl.BlockSpec((co, TM), lambda i: (0, i)))
    out_shape.append(jax.ShapeDtypeStruct((co, M_pad), jnp.float32))
    out_specs.append(pl.BlockSpec((co, TM), lambda i: (0, i)))

    kernel = _make_detect_kernel(s, nx, ny, TM, return_raw)
    outs = pl.pallas_call(
        kernel,
        out_shape=out_shape,
        grid_spec=pltpu.PrefetchScalarGridSpec(
            num_scalar_prefetch=0,
            grid=grid,
            in_specs=[
                pl.BlockSpec((cin, TM), lambda i: (0, i)),   # X^T tile (lanes = pixels)
                pl.BlockSpec((co, cin), lambda i: (0, 0)),   # conv weight (resident)
                pl.BlockSpec((co, 1), lambda i: (0, 0)),     # bias column
                pl.BlockSpec((co, 5), lambda i: (0, 0)),     # decode coefficients
            ],
            out_specs=out_specs,
        ),
        compiler_params=pltpu.CompilerParams(
            dimension_semantics=("parallel",),
            vmem_limit_bytes=vmem_limit),
        cost_estimate=cost,
    )(x_t, w_t, b_col, const)

    if return_raw:
        raw_t, y_t = outs
    else:
        (y_t,) = outs
        raw_t = None

    # rows are (a, o); columns are (b, yy, xx)  ->  PyTorch layouts.
    # TODO(synk): downstream consumers (NMS) could index the lane-dense (co, M)
    # layout directly and skip this permute, which is a full extra HBM pass.
    z = (y_t[:, :M].reshape(na, no, bs, ny, nx)
         .transpose(2, 0, 3, 4, 1)
         .reshape(bs, na * ny * nx, no))
    raw5 = None
    if raw_t is not None:
        raw5 = (raw_t[:, :M].reshape(na, no, bs, ny, nx)
                .transpose(2, 0, 3, 4, 1))
    return raw5, z


def detect_forward(xs_nchw, weights, biases, anchors, strides, *, no, na,
                   compute_dtype=jnp.bfloat16, return_raw=True,
                   raw_dtype=jnp.float32, num_cores=None):
    """Full Detect.forward (inference): returns (cat(z, 1), [x_i permuted]).

    For deployment set return_raw=False (skips the raw-logit writeback and its
    permute entirely) or raw_dtype=jnp.bfloat16 (halves it); box outputs z
    always stay f32.
    """
    if num_cores is None:
        num_cores = _default_num_cores()
    # TODO(synk): fusing all pyramid levels into one pallas_call (2D grid with
    # per-level scalar-prefetched offsets) would remove 2 of 3 launches; kept
    # per-level here because cin differs per level.
    raws, zs = [], []
    for i, x in enumerate(xs_nchw):
        raw5, z = detect_layer(x, weights[i], biases[i], anchors[i], strides[i],
                               no=no, na=na, compute_dtype=compute_dtype,
                               return_raw=return_raw, raw_dtype=raw_dtype,
                               num_cores=num_cores)
        raws.append(raw5)
        zs.append(z)
    return jnp.concatenate(zs, axis=1), raws


def detect_reference(xs_nchw, weights, biases, anchors, strides, *, no, na,
                     compute_dtype=jnp.bfloat16):
    """Pure-JAX reference mirroring the PyTorch semantics (same dtype policy)."""
    zs, raws = [], []
    for i, x in enumerate(xs_nchw):
        bs, cin, ny, nx = x.shape
        op_dtype = _matmul_dtype(cin, compute_dtype)
        xb = x.astype(op_dtype).astype(jnp.float32)
        wb = weights[i].astype(op_dtype).astype(jnp.float32)
        raw = jnp.einsum("bchw,oc->bohw", xb, wb,
                         precision=jax.lax.Precision.HIGHEST) \
            + biases[i].astype(jnp.float32).reshape(1, -1, 1, 1)
        raw5 = raw.reshape(bs, na, no, ny, nx).transpose(0, 1, 3, 4, 2)
        y = jax.nn.sigmoid(raw5)
        yv, xv = jnp.meshgrid(jnp.arange(ny, dtype=jnp.float32),
                              jnp.arange(nx, dtype=jnp.float32), indexing="ij")
        gridc = jnp.stack([xv, yv], axis=-1).reshape(1, 1, ny, nx, 2)
        xy = (y[..., 0:2] * 2.0 - 0.5 + gridc) * strides[i]
        wh = (y[..., 2:4] * 2.0) ** 2 * anchors[i].reshape(1, na, 1, 1, 2)
        yd = jnp.concatenate([xy, wh, y[..., 4:]], axis=-1)
        zs.append(yd.reshape(bs, -1, no))
        raws.append(raw5)
    return jnp.concatenate(zs, axis=1), raws


if __name__ == "__main__":
    # Module config (small): nc classes, 3 levels, 3 anchors per level.
    nc = 3
    no = nc + 5
    anchors_cfg = ((10., 13., 16., 30., 33., 23.),
                   (30., 61., 62., 45., 59., 119.),
                   (116., 90., 156., 198., 373., 326.))
    nl = len(anchors_cfg)
    na = len(anchors_cfg[0]) // 2
    anchors = jnp.asarray(anchors_cfg, dtype=jnp.float32).reshape(nl, na, 2)
    strides = (8.0, 16.0, 32.0)       # Detect.stride is set externally in PyTorch
    ch = (4, 8, 16)                   # exercises both f32 (cin<16) and bf16 paths
    bs = 2
    spatial = ((16, 16), (8, 8), (4, 4))

    key = jax.random.PRNGKey(0)
    keys = jax.random.split(key, 3 * nl)

    weights, biases, xs_nchw = [], [], []
    for i in range(nl):
        cin = ch[i]
        co = na * no
        # 1x1 conv weight in PyTorch (out_ch, in_ch) layout (1x1 dims squeezed).
        weights.append(0.1 * jax.random.normal(keys[3 * i], (co, cin), jnp.float32))
        biases.append(0.05 * jax.random.normal(keys[3 * i + 1], (co,), jnp.float32))
        ny, nx = spatial[i]
        xs_nchw.append(jax.random.normal(keys[3 * i + 2], (bs, cin, ny, nx),
                                         jnp.float32))

    z_out, x_out = detect_forward(xs_nchw, weights, biases, anchors, strides,
                                  no=no, na=na)
    jax.block_until_ready(z_out)
    for r in x_out:
        jax.block_until_ready(r)

    # Validate against the pure-JAX reference of the PyTorch forward.
    z_ref, x_ref = detect_reference(xs_nchw, weights, biases, anchors, strides,
                                    no=no, na=na)
    assert z_out.shape == (bs, na * sum(h * w for h, w in spatial), no)
    assert jnp.allclose(z_out, z_ref, atol=1e-3, rtol=1e-3), \
        float(jnp.max(jnp.abs(z_out - z_ref)))
    for a_, b_ in zip(x_out, x_ref):
        assert a_.shape == b_.shape
        assert jnp.allclose(a_, b_, atol=1e-3, rtol=1e-3), \
            float(jnp.max(jnp.abs(a_ - b_)))

    # TODO(synk): the PyTorch training-mode branch (returns the raw x list only)
    # and the host-side cached-grid / stride-buffer bookkeeping are module state,
    # not kernel ops; deployment should use return_raw=False / raw_dtype=bf16.
    print("KERNEL_OK")
</pallas_src>

<mosaic_0001>
module attributes {stable_mosaic.version = 11 : i64} {
  func.func @kernel(%arg0: i32, %arg1: memref<4x512xf32, #tpu.memory_space<vmem>>, %arg2: memref<24x4xf32, #tpu.memory_space<vmem>>, %arg3: memref<24x1xf32, #tpu.memory_space<vmem>>, %arg4: memref<24x5xf32, #tpu.memory_space<vmem>>, %arg5: memref<24x512xf32, #tpu.memory_space<vmem>>, %arg6: memref<24x512xf32, #tpu.memory_space<vmem>>) attributes {dimension_semantics = [#tpu.dimension_semantics<parallel>], iteration_bounds = array<i64: 1>, scalar_prefetch = 0 : i64, scratch_operands = 0 : i64, tpu.core_type = #tpu.core_type<tc>, window_params = [{transform_indices = @transform_0, window_bounds = array<i64: 4, 512>}, {pipeline_mode = #tpu.pipeline_mode<synchronous>, transform_indices = @transform_1, window_bounds = array<i64: 24, 4>}, {pipeline_mode = #tpu.pipeline_mode<synchronous>, transform_indices = @transform_2, window_bounds = array<i64: 24, 1>}, {pipeline_mode = #tpu.pipeline_mode<synchronous>, transform_indices = @transform_3, window_bounds = array<i64: 24, 5>}, {transform_indices = @transform_4, window_bounds = array<i64: 24, 512>}, {transform_indices = @transform_5, window_bounds = array<i64: 24, 512>}]} {
    %c0 = arith.constant 0 : index
    %c0_0 = arith.constant 0 : index
    %0 = vector.load %arg2[%c0, %c0_0] : memref<24x4xf32, #tpu.memory_space<vmem>>, vector<24x4xf32>
    %c0_1 = arith.constant 0 : index
    %c0_2 = arith.constant 0 : index
    %1 = vector.load %arg1[%c0_1, %c0_2] : memref<4x512xf32, #tpu.memory_space<vmem>>, vector<4x512xf32>
    %cst = arith.constant dense<0.000000e+00> : vector<24x512xf32>
    %2 = tpu.matmul %0, %1, %cst {dimension_numbers = #tpu.dot_dimension_numbers<[1], [0], [0], [1], [0, 0, 1, 1], [], []>} : vector<24x4xf32>, vector<4x512xf32>, vector<24x512xf32> -> vector<24x512xf32>
    %c0_3 = arith.constant 0 : index
    %c0_4 = arith.constant 0 : index
    %3 = vector.load %arg3[%c0_3, %c0_4] : memref<24x1xf32, #tpu.memory_space<vmem>>, vector<24x1xf32>
    %4 = vector.broadcast %3 : vector<24x1xf32> to vector<24x512xf32>
    %5 = arith.addf %2, %4 : vector<24x512xf32>
    %c0_5 = arith.constant 0 : index
    %c0_6 = arith.constant 0 : index
    %6 = vector.load %arg5[%c0_5, %c0_6] : memref<24x512xf32, #tpu.memory_space<vmem>>, vector<24x512xf32>
    tpu.vector_store %arg5[%c0_5, %c0_6], %5 {strides = array<i32>} : memref<24x512xf32, #tpu.memory_space<vmem>>, vector<24x512xf32>,
    %7 = arith.negf %5 : vector<24x512xf32>
    %8 = math.exp %7 : vector<24x512xf32>
    %cst_7 = arith.constant 1.000000e+00 : f32
    %9 = vector.broadcast %cst_7 : f32 to vector<24x512xf32>
    %10 = arith.addf %9, %8 : vector<24x512xf32>
    %11 = arith.divf %9, %10 : vector<24x512xf32>
    %c512_i32 = arith.constant 512 : i32
    %12 = arith.muli %arg0, %c512_i32 : i32
    %13 = tpu.iota {dimensions = array<i32: 1>} : vector<1x512xi32>
    %14 = vector.broadcast %12 : i32 to vector<1x512xi32>
    %15 = arith.addi %14, %13 : vector<1x512xi32>
    %16 = arith.sitofp %15 : vector<1x512xi32> to vector<1x512xf32>
    %cst_8 = arith.constant 5.000000e-01 : f32
    %17 = vector.broadcast %cst_8 : f32 to vector<1x512xf32>
    %18 = arith.addf %16, %17 : vector<1x512xf32>
    %cst_9 = arith.constant 2.560000e+02 : f32
    %19 = vector.broadcast %cst_9 : f32 to vector<1x512xf32>
    %20 = arith.divf %18, %19 : vector<1x512xf32>
    %21 = math.floor %20 : vector<1x512xf32>
    %cst_10 = arith.constant 2.560000e+02 : f32
    %22 = vector.broadcast %cst_10 : f32 to vector<1x512xf32>
    %23 = arith.mulf %22, %21 : vector<1x512xf32>
    %24 = arith.subf %16, %23 : vector<1x512xf32>
    %cst_11 = arith.constant 5.000000e-01 : f32
    %25 = vector.broadcast %cst_11 : f32 to vector<1x512xf32>
    %26 = arith.addf %24, %25 : vector<1x512xf32>
    %cst_12 = arith.constant 1.600000e+01 : f32
    %27 = vector.broadcast %cst_12 : f32 to vector<1x512xf32>
    %28 = arith.divf %26, %27 : vector<1x512xf32>
    %29 = math.floor %28 : vector<1x512xf32>
    %cst_13 = arith.constant 1.600000e+01 : f32
    %30 = vector.broadcast %cst_13 : f32 to vector<1x512xf32>
    %31 = arith.mulf %30, %29 : vector<1x512xf32>
    %32 = arith.subf %24, %31 : vector<1x512xf32>
    %c0_14 = arith.constant 0 : index
    %c0_15 = arith.constant 0 : index
    %33 = vector.load %arg4[%c0_14, %c0_15] : memref<24x5xf32, #tpu.memory_space<vmem>>, vector<24x1xf32>
    %c0_16 = arith.constant 0 : index
    %c1 = arith.constant 1 : index
    %34 = vector.load %arg4[%c0_16, %c1] : memref<24x5xf32, #tpu.memory_space<vmem>>, vector<24x1xf32>
    %c0_17 = arith.constant 0 : index
    %c2 = arith.constant 2 : index
    %35 = vector.load %arg4[%c0_17, %c2] : memref<24x5xf32, #tpu.memory_space<vmem>>, vector<24x1xf32>
    %c0_18 = arith.constant 0 : index
    %c3 = arith.constant 3 : index
    %36 = vector.load %arg4[%c0_18, %c3] : memref<24x5xf32, #tpu.memory_space<vmem>>, vector<24x1xf32>
    %c0_19 = arith.constant 0 : index
    %c4 = arith.constant 4 : index
    %37 = vector.load %arg4[%c0_19, %c4] : memref<24x5xf32, #tpu.memory_space<vmem>>, vector<24x1xf32>
    %38 = vector.broadcast %35 : vector<24x1xf32> to vector<24x512xf32>
    %39 = vector.broadcast %32 : vector<1x512xf32> to vector<24x512xf32>
    %40 = arith.mulf %38, %39 : vector<24x512xf32>
    %41 = vector.broadcast %36 : vector<24x1xf32> to vector<24x512xf32>
    %42 = vector.broadcast %29 : vector<1x512xf32> to vector<24x512xf32>
    %43 = arith.mulf %41, %42 : vector<24x512xf32>
    %44 = arith.addf %40, %43 : vector<24x512xf32>
    %45 = vector.broadcast %37 : vector<24x1xf32> to vector<24x512xf32>
    %46 = arith.addf %44, %45 : vector<24x512xf32>
    %47 = vector.broadcast %33 : vector<24x1xf32> to vector<24x512xf32>
    %48 = arith.mulf %47, %11 : vector<24x512xf32>
    %49 = vector.broadcast %34 : vector<24x1xf32> to vector<24x512xf32>
    %50 = arith.addf %48, %49 : vector<24x512xf32>
    %51 = arith.mulf %50, %11 : vector<24x512xf32>
    %52 = arith.addf %51, %46 : vector<24x512xf32>
    %c0_20 = arith.constant 0 : index
    %c0_21 = arith.constant 0 : index
    %53 = vector.load %arg6[%c0_20, %c0_21] : memref<24x512xf32, #tpu.memory_space<vmem>>, vector<24x512xf32>
    tpu.vector_store %arg6[%c0_20, %c0_21], %52 {strides = array<i32>} : memref<24x512xf32, #tpu.memory_space<vmem>>, vector<24x512xf32>,
    return
  }
  func.func @transform_0(%arg0: i32) -> (i32, i32) {
    %c0_i32 = arith.constant 0 : i32
    %c0_i32_0 = arith.constant 0 : i32
    return %c0_i32, %arg0 : i32, i32
  }
  func.func @transform_1(%arg0: i32) -> (i32, i32) {
    %c0_i32 = arith.constant 0 : i32
    %c0_i32_0 = arith.constant 0 : i32
    %c0_i32_1 = arith.constant 0 : i32
    return %c0_i32, %c0_i32_0 : i32, i32
  }
  func.func @transform_2(%arg0: i32) -> (i32, i32) {
    %c0_i32 = arith.constant 0 : i32
    %c0_i32_0 = arith.constant 0 : i32
    %c0_i32_1 = arith.constant 0 : i32
    return %c0_i32, %c0_i32_0 : i32, i32
  }
  func.func @transform_3(%arg0: i32) -> (i32, i32) {
    %c0_i32 = arith.constant 0 : i32
    %c0_i32_0 = arith.constant 0 : i32
    %c0_i32_1 = arith.constant 0 : i32
    return %c0_i32, %c0_i32_0 : i32, i32
  }
  func.func @transform_4(%arg0: i32) -> (i32, i32) {
    %c0_i32 = arith.constant 0 : i32
    %c0_i32_0 = arith.constant 0 : i32
    return %c0_i32, %arg0 : i32, i32
  }
  func.func @transform_5(%arg0: i32) -> (i32, i32) {
    %c0_i32 = arith.constant 0 : i32
    %c0_i32_0 = arith.constant 0 : i32
    return %c0_i32, %arg0 : i32, i32
  }
}

</mosaic_0001>

<bundles_post_ra>
// kernel: tpu_custom_call.1
= control target key start
LH: loop header
LB: loop body
LE: loop exit
PB: predicated region body
PF: predicated region fallthrough
CT: control target
= control target key end

     0   :  { %11 = vsyncpa [#allocation3], 0  ;;  %vm58_vm0 = vcmask 1043456   ;;  %v723_v4 = vmov 0.0   ;;  %vm48_vm1 = vcmask 31744   ;;  %v724_v6 = vmov 0   ;;  %s992_s0 = inlined_call_operand.vmem [shape: f32[4,512], index: 0, kind: input, shape index: {}]   ;;  %s993_s1 = inlined_call_operand.vmem [shape: f32[24,4], index: 1, kind: input, shape index: {}]   ;;  %s994_s2 = inlined_call_operand.vmem [shape: f32[24,1], index: 2, kind: input, shape index: {}]   ;;  %s995_s3 = inlined_call_operand.vmem [shape: f32[24,5], index: 3, kind: input, shape index: {}]   ;;  %s996_s4 = inlined_call_operand.hbm [shape: f32[24,512], index: 4, kind: output, shape index: {0}]   ;;  %s997_s5 = inlined_call_operand.hbm [shape: f32[24,512], index: 5, kind: output, shape index: {1}]  }
   0x1   :  { %v24_v0 = vld [vmem:[%s992_s0] sm:$0xff]  ;;  %v25_v1 = vld [vmem:[%s992_s0 + $0x8] sm:$0xff]  ;;  %131 = vmatprep.mubr.f32.mxu0 %v723_v4  ;;  %214 = vmatprep.mubr.f32.mxu1 %v723_v4 }
   0x2   :  { %v46_v2 = vcombine.high %v24_v0, %v24_v0  ;;  %v47_v3 = vcombine.high %v25_v1, %v25_v1  ;;  %v21_v5 = vld [vmem:[%s993_s1] sm:$0xff]  ;;  %613 = vset.pattern.permute.xlu1 %v724_v6  ;;  %612 = vset.pattern.permute.xlu0 %v724_v6 }
   0x4   :  { %580 = vmatprep.subr.msk.mxu0 %vm58_vm0, %v46_v2  ;;  %585 = vmatprep.subr.msk.mxu1 %vm58_vm0, %v47_v3 }
   0x5   :  { %12 = vsyncpa [#allocation5], 0  ;;  %581 = vmatpush1.msk.msra.mxu0 %vm58_vm0, %v24_v0  ;;  %586 = vmatpush1.msk.msra.mxu1 %vm58_vm0, %v25_v1  ;;  %v28_v7 = vld [vmem:[%s994_s2 + $0x10] sm:$0xff]  ;;  %v26_v8 = vld [vmem:[%s994_s2] sm:$0xff]  ;;  %v725_v13 = vmov 2   ;;  %v726_v16 = vmov 3   ;;  %v318_v19 = vlaneseq }
   0x6   :  { %582 = vmatmul.mubr.msk.f32.vlgmr.msra.gmra.mrb[0].mxu0 %vm48_vm1, %v21_v5  ;;  %587 = vmatmul.mubr.msk.f32.vlgmr.msra.gmra.mrb[0].mxu1 %vm48_vm1, %v21_v5  ;;  %v22_v9 = vld [vmem:[%s993_s1 + $0x8] sm:$0xff]  ;;  %v374_v11 = vld [vmem:[%s995_s3] sm:$0xff]  ;;  %v23_v12 = vld [vmem:[%s993_s1 + $0x10] sm:$0xff]  ;;  %v727_v17 = vmov 1   ;;  %v728_v18 = vmov 4   ;;  %s729_s1 = smov [#allocation2]  }
   0x7   :  { %137 = vmatprep.mubr.f32.mxu0 %v723_v4  ;;  %220 = vmatprep.mubr.f32.mxu1 %v723_v4  ;;  %v27_v10 = vld [vmem:[%s994_s2 + $0x8] sm:$0xff]  ;;  %v376_v14 = vld [vmem:[%s995_s3 + $0x10] sm:$0xff]  ;;  %v319_v20 = vand.u32 127, %v318_v19 }
   0x8   :  { %41 = vperm.xlu1 %613, %v28_v7   ;;  %31 = vperm.xlu0 %612, %v26_v8   ;;  %v375_v15 = vld [vmem:[%s995_s3 + $0x8] sm:$0xff]  ;;  %s553_s3 = sshll.u32 %s729_s1, 4  ;;  %s848_s3 = int_to_ptr.vmem [resolvable:$true] %s553_s3 }
   0x9   :  { %v320_v21 = vadd.s32 128, %v319_v20  ;;  %v321_v22 = vadd.s32 256, %v319_v20  ;;  %v322_v23 = vadd.s32 384, %v319_v20  ;;  %v328_v24 = vcvt.s32.f32 %v319_v20  ;;  %s675_s13 = scalar_lea.vmem %s848_s3, 1536  ;;  %p680_p1 = scmp.lt.s32.totalorder %s848_s3, %s848_s3 }
   0xa   :  { %583 = vmatmul.mubr.msk.f32.gmra.mrb[2].mxu0 %vm48_vm1, %v22_v9  ;;  %588 = vmatmul.mubr.msk.f32.gmra.mrb[2].mxu1 %vm48_vm1, %v22_v9  ;;  %p676_p0 = scmp.ne.s32.totalorder %s848_s3, %s675_s13  ;;  %p681_p2 = scmp.lt.s32.totalorder %s675_s13, %s675_s13 }
   0xb   :  { %143 = vmatprep.mubr.f32.mxu0 %v723_v4  ;;  %226 = vmatprep.mubr.f32.mxu1 %v723_v4  ;;  %v329_v25 = vcvt.s32.f32 %v320_v21  ;;  %v330_v26 = vcvt.s32.f32 %v321_v22  ;;  %v331_v27 = vcvt.s32.f32 %v322_v23  ;;  %v332_v28 = vadd.f32 0.5, %v328_v24 }
   0xc   :  { %614 = vset.pattern.permute.xlu1 %v725_v13  ;;  %36 = vperm.xlu0 %612, %v27_v10   ;;  %p682_p3 = por %p681_p2, %p680_p1 }
   0xd   :  { %379 = vperm.xlu1 %614, %v374_v11   ;;  %v333_v29 = vadd.f32 0.5, %v329_v25  ;;  %v334_v30 = vadd.f32 0.5, %v330_v26  ;;  %v335_v32 = vadd.f32 0.5, %v331_v27  ;;  %v337_v33 = vmul.f32 0.00390625, %v332_v28 }
   0xe   :  { %584 = vmatmul.mubr.msk.f32.gmra.mrb[4].mxu0 %vm48_vm1, %v23_v12  ;;  %589 = vmatmul.mubr.msk.f32.gmra.mrb[4].mxu1 %vm48_vm1, %v23_v12  ;;  %p683_p4 = pnand %p682_p3, %p676_p0 }
   0xf   :  { %v338_v34 = vmul.f32 0.00390625, %v333_v29  ;;  %v339_v35 = vmul.f32 0.00390625, %v334_v30  ;;  %v340_v36 = vmul.f32 0.00390625, %v335_v32  ;;  %v341_v37 = vfloor.f32 %v337_v33 }
  0x10   :  { %615 = vset.pattern.permute.xlu0 %v725_v13 }
  0x11   :  { %389 = vperm.xlu1 %614, %v376_v14   ;;  %384 = vperm.xlu0 %615, %v375_v15   ;;  %v342_v38 = vfloor.f32 %v338_v34  ;;  %v343_v40 = vfloor.f32 %v339_v35  ;;  %v344_v41 = vfloor.f32 %v340_v36  ;;  %v345_v42 = vmul.f32 256.0, %v341_v37 }
  0x13   :  { %v346_v43 = vmul.f32 256.0, %v342_v38  ;;  %v347_v44 = vmul.f32 256.0, %v343_v40  ;;  %v348_v45 = vmul.f32 256.0, %v344_v41  ;;  %v349_v46 = vsub.f32 %v328_v24, %v345_v42 }
  0x15   :  { %616 = vset.pattern.permute.xlu1 %v726_v16  ;;  %617 = vset.pattern.permute.xlu0 %v726_v16  ;;  %v812_v49 = vsub.f32 %v329_v25, %v346_v43  ;;  %v814_v50 = vsub.f32 %v330_v26, %v347_v44  ;;  %v816_v51 = vsub.f32 %v331_v27, %v348_v45  ;;  %v353_v52 = vadd.f32 0.5, %v349_v46 }
  0x16   :  { %405 = vperm.xlu1 %616, %v374_v11   ;;  %409 = vperm.xlu0 %617, %v375_v15  }
  0x17   :  { %v354_v53 = vadd.f32 0.5, %v812_v49  ;;  %v355_v56 = vadd.f32 0.5, %v814_v50  ;;  %v356_v57 = vadd.f32 0.5, %v816_v51  ;;  %v358_v58 = vmul.f32 0.0625, %v353_v52 }
  0x19   :  { %v359_v59 = vmul.f32 0.0625, %v354_v53  ;;  %v360_v60 = vmul.f32 0.0625, %v355_v56  ;;  %v361_v61 = vmul.f32 0.0625, %v356_v57  ;;  %v823_v62 = vfloor.f32 %v358_v58 }
  0x1a   :  { %413 = vperm.xlu1 %616, %v376_v14   ;;  %619 = vset.pattern.permute.xlu0 %v724_v6 }
  0x1b   :  { %469 = vperm.xlu0 %619, %v375_v15   ;;  %v829_v3 = vfloor.f32 %v359_v59  ;;  %v831_v8 = vfloor.f32 %v360_v60  ;;  %v366_v12 = vmul.f32 16.0, %v823_v62 }
  0x1d   :  { %v367_v19 = vmul.f32 16.0, %v829_v3  ;;  %v368_v24 = vmul.f32 16.0, %v831_v8  ;;  %v843_v33 = vsub.f32 %v349_v46, %v366_v12 }
  0x1e   :  { %618 = vset.pattern.permute.xlu1 %v724_v6 }
  0x1f   :  { %465 = vperm.xlu1 %618, %v374_v11   ;;  %621 = vset.pattern.permute.xlu0 %v727_v17  ;;  %v371_v38 = vsub.f32 %v812_v49, %v367_v19  ;;  %v372_v44 = vsub.f32 %v814_v50, %v368_v24 }
  0x20   :  { %493 = vperm.xlu0 %621, %v375_v15  }
  0x23   :  { %473 = vperm.xlu1 %618, %v376_v14  }
  0x24   :  { %623 = vset.pattern.permute.xlu0 %v728_v18 }
  0x25   :  { %445 = vperm.xlu0 %623, %v375_v15  }
  0x27   :  { %620 = vset.pattern.permute.xlu1 %v727_v17 }
  0x28   :  { %489 = vperm.xlu1 %620, %v374_v11  }
  0x29   :  { %624 = vset.pattern.permute.xlu0 %v727_v17 }
  0x2c   :  { %497 = vperm.xlu1 %620, %v376_v14  }
  0x30   :  { %622 = vset.pattern.permute.xlu1 %v728_v18 }
  0x31   :  { %441 = vperm.xlu1 %622, %v374_v11   ;;  %v833_v11 = vfloor.f32 %v361_v61 }
  0x33   :  { %v369_v27 = vmul.f32 16.0, %v833_v11 }
  0x35   :  { %449 = vperm.xlu1 %622, %v376_v14  }
  0x87   :  { %v806_v31 = vpop.permute.xlu1 %41  ;;  %v32_v48 = vpop.permute.xlu0 %31 }
  0x8b   :  { %v37_v55 = vpop.permute.xlu0 %36 }
  0x8c   :  { %v808_v39 = vpop.permute.xlu1 %379 }
  0x90   :  { %v810_v47 = vpop.permute.xlu1 %389  ;;  %v827_v0 = vpop.permute.xlu0 %384 }
  0x95   :  { %v819_v54 = vpop.permute.xlu1 %405  ;;  %v841_v32 = vpop.permute.xlu0 %409 }
  0x99   :  { %v825_v63 = vpop.permute.xlu1 %413 }
  0x9e   :  { %v839_v28 = vpop.permute.xlu1 %465 }
  0xd9   :  { %v133_v1 = vpop.f32.mrb[0].mxu0  ;;  %v216_v2 = vpop.f32.mrb[0].mxu1 }
  0xda   :  { %v134_v4 = vadd.f32 %v133_v1, %v32_v48  ;;  %v217_v5 = vadd.f32 %v216_v2, %v32_v48  ;;  %v135_v6 = vpop.f32.mrb[1].mxu0  ;;  %v218_v7 = vpop.f32.mrb[1].mxu1 }
  0xdb   :  { %v136_v9 = vadd.f32 %v135_v6, %v32_v48  ;;  %v219_v10 = vadd.f32 %v218_v7, %v32_v48  ;;  %v373_v48 = vsub.f32 %v816_v51, %v369_v27 }
  0xdc   :  { %233 = vst [vmem:[#allocation2] sm:$0xff] %v134_v4  ;;  %v590_v13 = vmul.f32 -1.442695, %v134_v4  ;;  %235 = vst [vmem:[#allocation2 + $0x10] sm:$0xff] %v217_v5  ;;  %v592_v14 = vmul.f32 -1.442695, %v217_v5 }
  0xdd   :  { %234 = vst [vmem:[#allocation2 + $0x8] sm:$0xff] %v136_v9  ;;  %v591_v15 = vmul.f32 -1.442695, %v136_v9  ;;  %236 = vst [vmem:[#allocation2 + $0x18] sm:$0xff] %v219_v10  ;;  %v593_v16 = vmul.f32 -1.442695, %v219_v10 }
  0xde   :  { %v139_v17 = vpop.f32.mrb[2].mxu0  ;;  %v222_v18 = vpop.f32.mrb[2].mxu1  ;;  %627 = vpow2.f32 %v590_v13 }
  0xdf   :  { %v140_v20 = vadd.f32 %v139_v17, %v37_v55  ;;  %v223_v21 = vadd.f32 %v222_v18, %v37_v55  ;;  %v141_v22 = vpop.f32.mrb[3].mxu0  ;;  %v224_v23 = vpop.f32.mrb[3].mxu1  ;;  %629 = vpow2.f32 %v592_v14 }
  0xe0   :  { %v142_v25 = vadd.f32 %v141_v22, %v37_v55  ;;  %v225_v26 = vadd.f32 %v224_v23, %v37_v55  ;;  %631 = vpow2.f32 %v591_v15  ;;  %v854_v55 = vpop.permute.xlu1 %473 }
  0xe1   :  { %237 = vst [vmem:[#allocation2 + $0x20] sm:$0xff] %v140_v20  ;;  %v594_v29 = vmul.f32 -1.442695, %v140_v20  ;;  %239 = vst [vmem:[#allocation2 + $0x30] sm:$0xff] %v223_v21  ;;  %v596_v30 = vmul.f32 -1.442695, %v223_v21  ;;  %633 = vpow2.f32 %v593_v16 }
  0xe2   :  { %238 = vst [vmem:[#allocation2 + $0x28] sm:$0xff] %v142_v25  ;;  %v595_v34 = vmul.f32 -1.442695, %v142_v25  ;;  %240 = vst [vmem:[#allocation2 + $0x38] sm:$0xff] %v225_v26  ;;  %v597_v35 = vmul.f32 -1.442695, %v225_v26 }
  0xe3   :  { %v145_v36 = vpop.f32.mrb[4].mxu0  ;;  %v228_v37 = vpop.f32.mrb[4].mxu1  ;;  %635 = vpow2.f32 %v594_v29 }
  0xe4   :  { %v146_v40 = vadd.f32 %v145_v36, %v806_v31  ;;  %v229_v41 = vadd.f32 %v228_v37, %v806_v31  ;;  %v147_v42 = vpop.f32.mrb[5].mxu0  ;;  %v230_v43 = vpop.f32.mrb[5].mxu1  ;;  %637 = vpow2.f32 %v596_v30 }
  0xe5   :  { %v148_v45 = vadd.f32 %v147_v42, %v806_v31  ;;  %v231_v46 = vadd.f32 %v230_v43, %v806_v31  ;;  %639 = vpow2.f32 %v595_v34 }
  0xe6   :  { %241 = vst [vmem:[#allocation2 + $0x40] sm:$0xff] %v146_v40  ;;  %v598_v49 = vmul.f32 -1.442695, %v146_v40  ;;  %243 = vst [vmem:[#allocation2 + $0x50] sm:$0xff] %v229_v41  ;;  %v600_v52 = vmul.f32 -1.442695, %v229_v41  ;;  %641 = vpow2.f32 %v597_v35 }
  0xe7   :  { %242 = vst [vmem:[#allocation2 + $0x48] sm:$0xff] %v148_v45  ;;  %v599_v53 = vmul.f32 -1.442695, %v148_v45  ;;  %244 = vst [vmem:[#allocation2 + $0x58] sm:$0xff] %v231_v46  ;;  %v601_v50 = vmul.f32 -1.442695, %v231_v46 }
  0xe8   :  { %643 = vpow2.f32 %v598_v49 }
  0xe9   :  { %686 = shalt.err (!%p683_p4)
}
  0xea   :  { %s687_s16 = scalar_lea.hbm %s996_s4, 1536 }
  0xeb   :  { %p688_p5 = scmp.ne.s32.totalorder %s996_s4, %s687_s16  ;;  %p691_p6 = scmp.lt.u32.totalorder %s687_s16, %s996_s4 }
  0xed   :  { %p693_p7 = pnand %p691_p6, %p688_p5 }
  0xef   :  { %696 = shalt.err (!%p693_p7)
}
  0xf0   :  { %s730_s21 = smov 512   ;;  %s731_s22 = smov 32   ;;  %v392_v31 = vmul.f32 %v808_v39, %v843_v33  ;;  %v393_v51 = vmul.f32 %v808_v39, %v371_v38  ;;  %645 = vpow2.f32 %v600_v52  ;;  %v628_v56 = vpop.eup %627  ;;  %v880_v57 = vmul.f32 %v808_v39, %v372_v44  ;;  %v889_v60 = vpop.permute.xlu0 %469 }
  0xf1   :  { %559 = dma.vmem_to_hbm [thread:$0]  %s848_s3, 1536, %s996_s4, [#allocation3], %s730_s21, %s730_s21, %s731_s22   ;;  %v883_v58 = vmul.f32 %v808_v39, %v373_v48  ;;  %v887_v59 = vmul.f32 %v810_v47, %v843_v33  ;;  %647 = vpow2.f32 %v599_v53  ;;  %v630_v61 = vpop.eup %629  ;;  %v892_v1 = vmul.f32 %v810_v47, %v371_v38  ;;  %v909_v17 = vpop.permute.xlu1 %489 }
  0xf2   :  { %v895_v2 = vmul.f32 %v810_v47, %v372_v44  ;;  %v281_v4 = vadd.f32 1.0, %v628_v56  ;;  %649 = vpow2.f32 %v601_v50  ;;  %v632_v5 = vpop.eup %631  ;;  %v898_v39 = vmul.f32 %v810_v47, %v373_v48  ;;  %s732_s4 = smov [#allocation4]  }
  0xf3   :  { %v283_v6 = vadd.f32 1.0, %v630_v61  ;;  %v396_v7 = vmul.f32 %v827_v0, %v843_v33  ;;  %v397_v9 = vmul.f32 %v827_v0, %v371_v38  ;;  %v634_v10 = vpop.eup %633  ;;  %v282_v12 = vadd.f32 1.0, %v632_v5  ;;  %s565_s24 = sshll.u32 %s732_s4, 4  ;;  %s566_s24 = int_to_ptr.vmem [resolvable:$true] %s565_s24 }
  0xf4   :  { %651 = vrcp.f32 %v281_v4  ;;  %v398_v13 = vmul.f32 %v827_v0, %v372_v44  ;;  %v399_v14 = vmul.f32 %v827_v0, %v373_v48  ;;  %v636_v15 = vpop.eup %635  ;;  %v416_v16 = vmul.f32 %v819_v54, %v823_v62  ;;  %v919_v26 = vpop.permute.xlu0 %493  ;;  %s697_s25 = scalar_lea.vmem %s566_s24, 1536  ;;  %p702_p9 = scmp.lt.s32.totalorder %s566_s24, %s566_s24 }
  0xf5   :  { %v417_v47 = vmul.f32 %v819_v54, %v829_v3  ;;  %653 = vrcp.f32 %v283_v6  ;;  %v284_v18 = vadd.f32 1.0, %v634_v10  ;;  %v638_v19 = vpop.eup %637  ;;  %v418_v20 = vmul.f32 %v819_v54, %v831_v8  ;;  %p698_p8 = scmp.ne.s32.totalorder %s566_s24, %s697_s25  ;;  %p703_p10 = scmp.lt.s32.totalorder %s697_s25, %s697_s25 }
  0xf6   :  { %655 = vrcp.f32 %v282_v12  ;;  %v285_v21 = vadd.f32 1.0, %v636_v15  ;;  %v420_v0 = vmul.f32 %v841_v32, %v823_v62  ;;  %v640_v22 = vpop.eup %639  ;;  %v419_v23 = vmul.f32 %v819_v54, %v833_v11 }
  0xf7   :  { %657 = vrcp.f32 %v284_v18  ;;  %v287_v24 = vadd.f32 1.0, %v638_v19  ;;  %v421_v25 = vmul.f32 %v841_v32, %v829_v3  ;;  %v642_v27 = vpop.eup %641  ;;  %v286_v29 = vadd.f32 1.0, %v640_v22  ;;  %p704_p11 = por %p703_p10, %p702_p9 }
  0xf8   :  { %659 = vrcp.f32 %v285_v21  ;;  %v422_v30 = vmul.f32 %v841_v32, %v831_v8  ;;  %v423_v33 = vmul.f32 %v841_v32, %v833_v11  ;;  %v644_v34 = vpop.eup %643  ;;  %v428_v35 = vadd.f32 %v416_v16, %v392_v31  ;;  %v931_v32 = vpop.permute.xlu1 %497 }
  0xf9   :  { %v429_v36 = vadd.f32 %v417_v47, %v393_v51  ;;  %661 = vrcp.f32 %v287_v24  ;;  %v288_v54 = vadd.f32 1.0, %v642_v27  ;;  %v424_v38 = vmul.f32 %v825_v63, %v823_v62  ;;  %v446_v31 = vpop.permute.xlu0 %445  ;;  %p705_p12 = pnand %p704_p11, %p698_p8 }
  0xfa   :  { %v646_v37 = vpop.eup %645  ;;  %663 = vrcp.f32 %v286_v29  ;;  %v289_v40 = vadd.f32 1.0, %v644_v34  ;;  %v432_v41 = vadd.f32 %v420_v0, %v396_v7  ;;  %v425_v43 = vmul.f32 %v825_v63, %v829_v3 }
  0xfb   :  { %v648_v42 = vpop.eup %647  ;;  %v426_v44 = vmul.f32 %v825_v63, %v831_v8  ;;  %665 = vrcp.f32 %v288_v54  ;;  %v291_v45 = vadd.f32 1.0, %v646_v37  ;;  %v427_v48 = vmul.f32 %v825_v63, %v833_v11 }
  0xfc   :  { %v650_v46 = vpop.eup %649  ;;  %667 = vrcp.f32 %v289_v40  ;;  %v290_v62 = vadd.f32 1.0, %v648_v42  ;;  %v433_v49 = vadd.f32 %v421_v25, %v397_v9  ;;  %v434_v53 = vadd.f32 %v422_v30, %v398_v13  ;;  %v442_v9 = vpop.permute.xlu1 %441 }
  0xfd   :  { %669 = vrcp.f32 %v291_v45  ;;  %v292_v52 = vadd.f32 1.0, %v650_v46  ;;  %v435_v50 = vadd.f32 %v423_v33, %v399_v14  ;;  %v430_v51 = vadd.f32 %v418_v20, %v880_v57 }
  0xfe   :  { %v652_v3 = vpop.eup %651  ;;  %v431_v8 = vadd.f32 %v419_v23, %v883_v58  ;;  %v938_v56 = vadd.f32 %v424_v38, %v887_v59  ;;  %671 = vrcp.f32 %v290_v62  ;;  %v942_v11 = vadd.f32 %v425_v43, %v892_v1 }
  0xff   :  { %v654_v61 = vpop.eup %653  ;;  %v476_v63 = vmul.f32 %v652_v3, %v839_v28  ;;  %v945_v4 = vadd.f32 %v426_v44, %v895_v2  ;;  %673 = vrcp.f32 %v292_v52  ;;  %v949_v57 = vadd.f32 %v427_v48, %v898_v39 }
 0x100   :  { %v656_v5 = vpop.eup %655  ;;  %v478_v6 = vmul.f32 %v654_v61, %v839_v28  ;;  %v456_v58 = vadd.f32 %v446_v31, %v432_v41  ;;  %v457_v59 = vadd.f32 %v446_v31, %v433_v49  ;;  %v458_v1 = vadd.f32 %v446_v31, %v434_v53  ;;  %v450_v45 = vpop.permute.xlu1 %449 }
 0x101   :  { %v658_v7 = vpop.eup %657  ;;  %v500_v10 = vadd.f32 %v909_v17, %v476_v63  ;;  %v477_v12 = vmul.f32 %v656_v5, %v839_v28  ;;  %v459_v13 = vadd.f32 %v446_v31, %v435_v50  ;;  %v452_v2 = vadd.f32 %v442_v9, %v428_v35 }
 0x102   :  { %v660_v14 = vpop.eup %659  ;;  %v453_v15 = vadd.f32 %v442_v9, %v429_v36  ;;  %v502_v16 = vadd.f32 %v909_v17, %v478_v6  ;;  %v479_v47 = vmul.f32 %v658_v7, %v839_v28  ;;  %v454_v39 = vadd.f32 %v442_v9, %v430_v51 }
 0x103   :  { %v662_v18 = vpop.eup %661  ;;  %v512_v19 = vmul.f32 %v652_v3, %v500_v10  ;;  %v501_v20 = vadd.f32 %v909_v17, %v477_v12  ;;  %v480_v21 = vmul.f32 %v660_v14, %v889_v60  ;;  %v455_v22 = vadd.f32 %v442_v9, %v431_v8 }
 0x104   :  { %v664_v0 = vpop.eup %663  ;;  %v514_v23 = vmul.f32 %v654_v61, %v502_v16  ;;  %v503_v24 = vadd.f32 %v909_v17, %v479_v47  ;;  %v482_v25 = vmul.f32 %v662_v18, %v889_v60  ;;  %v460_v61 = vadd.f32 %v450_v45, %v938_v56 }
 0x105   :  { %v666_v27 = vpop.eup %665  ;;  %v524_v29 = vadd.f32 %v512_v19, %v452_v2  ;;  %v513_v30 = vmul.f32 %v656_v5, %v501_v20  ;;  %v481_v33 = vmul.f32 %v664_v0, %v889_v60  ;;  %v504_v28 = vadd.f32 %v919_v26, %v480_v21 }
 0x106   :  { %v668_v34 = vpop.eup %667  ;;  %v526_v35 = vadd.f32 %v514_v23, %v454_v39  ;;  %v515_v36 = vmul.f32 %v658_v7, %v503_v24  ;;  %v483_v54 = vmul.f32 %v666_v27, %v889_v60  ;;  %v506_v37 = vadd.f32 %v919_v26, %v482_v25 }
 0x107   :  { %v670_v38 = vpop.eup %669  ;;  %536 = vst [vmem:[#allocation4] sm:$0xff] %v524_v29  ;;  %v525_v40 = vadd.f32 %v513_v30, %v453_v15  ;;  %v484_v17 = vmul.f32 %v668_v34, %v854_v55  ;;  %v505_v41 = vadd.f32 %v919_v26, %v481_v33  ;;  %v516_v42 = vmul.f32 %v660_v14, %v504_v28 }
 0x108   :  { %v672_v43 = vpop.eup %671  ;;  %538 = vst [vmem:[#allocation4 + $0x10] sm:$0xff] %v526_v35  ;;  %v527_v44 = vadd.f32 %v515_v36, %v455_v22  ;;  %v486_v46 = vmul.f32 %v670_v38, %v854_v55  ;;  %v507_v48 = vadd.f32 %v919_v26, %v483_v54  ;;  %v518_v62 = vmul.f32 %v662_v18, %v506_v37 }
 0x109   :  { %v674_v60 = vpop.eup %673  ;;  %537 = vst [vmem:[#allocation4 + $0x8] sm:$0xff] %v525_v40  ;;  %v508_v49 = vadd.f32 %v931_v32, %v484_v17  ;;  %v485_v52 = vmul.f32 %v672_v43, %v854_v55  ;;  %v517_v53 = vmul.f32 %v664_v0, %v505_v41  ;;  %v528_v50 = vadd.f32 %v516_v42, %v456_v58 }
 0x10a   :  { %539 = vst [vmem:[#allocation4 + $0x18] sm:$0xff] %v527_v44  ;;  %v510_v31 = vadd.f32 %v931_v32, %v486_v46  ;;  %v487_v3 = vmul.f32 %v674_v60, %v854_v55  ;;  %v519_v51 = vmul.f32 %v666_v27, %v507_v48  ;;  %v530_v8 = vadd.f32 %v518_v62, %v458_v1 }
 0x10b   :  { %v520_v63 = vmul.f32 %v668_v34, %v508_v49  ;;  %v509_v26 = vadd.f32 %v931_v32, %v485_v52  ;;  %v529_v5 = vadd.f32 %v517_v53, %v457_v59  ;;  %540 = vst [vmem:[#allocation4 + $0x20] sm:$0xff] %v528_v50  ;;  %v462_v6 = vadd.f32 %v450_v45, %v945_v4 }
 0x10c   :  { %v522_v7 = vmul.f32 %v670_v38, %v510_v31  ;;  %v511_v9 = vadd.f32 %v931_v32, %v487_v3  ;;  %v531_v58 = vadd.f32 %v519_v51, %v459_v13  ;;  %542 = vst [vmem:[#allocation4 + $0x30] sm:$0xff] %v530_v8  ;;  %v461_v10 = vadd.f32 %v450_v45, %v942_v11 }
 0x10d   :  { %v532_v12 = vadd.f32 %v520_v63, %v460_v61  ;;  %v521_v55 = vmul.f32 %v672_v43, %v509_v26  ;;  %541 = vst [vmem:[#allocation4 + $0x28] sm:$0xff] %v529_v5  ;;  %v463_v56 = vadd.f32 %v450_v45, %v949_v57 }
 0x10e   :  { %v534_v1 = vadd.f32 %v522_v7, %v462_v6  ;;  %v523_v14 = vmul.f32 %v674_v60, %v511_v9  ;;  %543 = vst [vmem:[#allocation4 + $0x38] sm:$0xff] %v531_v58 }
 0x10f   :  { %544 = vst [vmem:[#allocation4 + $0x40] sm:$0xff] %v532_v12  ;;  %v533_v59 = vadd.f32 %v521_v55, %v461_v10 }
 0x110   :  { %546 = vst [vmem:[#allocation4 + $0x50] sm:$0xff] %v534_v1  ;;  %v535_v4 = vadd.f32 %v523_v14, %v463_v56 }
 0x111   :  { %545 = vst [vmem:[#allocation4 + $0x48] sm:$0xff] %v533_v59 }
 0x112   :  { %547 = vst [vmem:[#allocation4 + $0x58] sm:$0xff] %v535_v4 }
 0x113   :  { %708 = shalt.err (!%p705_p12)
}
 0x114   :  { %s709_s28 = scalar_lea.hbm %s997_s5, 1536 }
 0x115   :  { %p710_p13 = scmp.ne.s32.totalorder %s997_s5, %s709_s28  ;;  %p713_p0 = scmp.lt.u32.totalorder %s709_s28, %s997_s5 }
 0x117   :  { %p715_p1 = pnand %p713_p0, %p710_p13 }
 0x119   :  { %718 = shalt.err (!%p715_p1)
}
 0x11a   :  { %571 = dma.vmem_to_hbm [thread:$0]  %s566_s24, 1536, %s997_s5, [#allocation5], %s730_s21, %s730_s21, %s731_s22  }
 0x11b   :  { %719 = dma.done.wait [#allocation3], 1536  }
 0x11c   :  { %720 = vsyncadd [#allocation3], 4294965760 }
 0x11d   :  { %721 = dma.done.wait [#allocation5], 1536  }
 0x11e   :  { %722 = vsyncadd [#allocation5], 4294965760 }
 0x11f   :  { %578 = vsyncpa [#allocation3], 1 }
 0x120   :  { %579 = vsyncpa [#allocation5], 1 }

</bundles_post_ra>
